<compile_context>
chip_gen: v7x
topology: tpu7x:2x2x1
jax: 0.10.0
libtpu: 0.0.40
codegen_flags: <defaults>
</compile_context>

<pallas_src>
import math

import jax
import jax.numpy as jnp
from jax.experimental import pallas as pl
from jax.experimental.pallas import tpu as pltpu


def _vocab_emb_kernel(inp_ref, base_ref, delta_ref, out_ref):
    """Fused VocabEmb forward for one (batch, seq-tile) grid step.

    inp_ref   : (1, tN, 1) int32   pixel values in {0, 1}
    base_ref  : (tN, D)    float32 folded positional + pixel-0 term
    delta_ref : (1, D)     float32 folded (pixel-1 - pixel-0) mapped row
    out_ref   : (1, tN, D) float32
    """
    inp_f = inp_ref[0].astype(jnp.float32)                    # (tN, 1)
    out = base_ref[...] + inp_f * delta_ref[...]              # (tN, D) on VPU
    out_ref[0] = out.astype(out_ref.dtype)


def init_vocab_emb_params(key, d_model, size=(8, 8)):
    """Deterministic synthetic init matching the PyTorch parameter shapes."""
    H, W = size
    k1, k2, k3, k4 = jax.random.split(key, 4)
    map_w = jax.random.normal(k1, (2, d_model), jnp.float32)        # Embedding(2, D)
    posencx_w = jax.random.normal(k2, (H, d_model), jnp.float32)    # Embedding(H, D)
    posency_w = jax.random.normal(k3, (W, d_model), jnp.float32)    # Embedding(W, D)
    # nn.Linear(3D, D, bias=False): weight shape (D, 3D)
    limit = 1.0 / math.sqrt(3 * d_model)
    mapper_w = jax.random.uniform(k4, (d_model, 3 * d_model),
                                  jnp.float32, -limit, limit)
    return dict(map_w=map_w, posencx_w=posencx_w,
                posency_w=posency_w, mapper_w=mapper_w)


def prepare_vocab_emb(params, size):
    """One-time prep: fold EVERY batch-invariant term.

    mapper(cat([pix, xpos, ypos])) == pix@Wp^T + xpos@Wx^T + ypos@Wy^T, and
    both positional matmuls and the (vocab=2) pixel matmul are input-data
    independent, so they are evaluated once here.
    """
    H, W = size
    D = params["map_w"].shape[1]
    wt = jnp.transpose(params["mapper_w"])                   # (3D, D)
    w_pix_t = wt[0:D]                                        # (D, D)
    w_x_t = wt[D:2 * D]                                      # (D, D)
    w_y_t = wt[2 * D:3 * D]                                  # (D, D)
    # PosEmb 'standard': for n = w*H + h -> xpos[n]=posencx[h], ypos[n]=posency[w]
    xtab = jnp.tile(params["posencx_w"], (W, 1))             # (N, D)
    ytab = jnp.repeat(params["posency_w"], H, axis=0)        # (N, D)
    pos_bias = xtab @ w_x_t + ytab @ w_y_t                   # (N, D)
    map_mapped = params["map_w"] @ w_pix_t                   # (2, D)
    base = pos_bias + map_mapped[0]                          # (N, D)
    delta = (map_mapped[1] - map_mapped[0])[None, :]         # (1, D)
    return dict(base=base, delta=delta)


def vocab_emb_forward(inp, prep):
    """inp: (B, N) int array of {0, 1}; returns (B, N, D) float32."""
    B, N = inp.shape
    D = prep["base"].shape[1]
    tN = min(N, 512)                      # ~rows per tile; full N at demo scale
    grid = (B, pl.cdiv(N, tN))

    inp_col = inp.reshape(B, N, 1).astype(jnp.int32)   # 4 B/token, no one-hot

    return pl.pallas_call(
        _vocab_emb_kernel,
        out_shape=jax.ShapeDtypeStruct((B, N, D), jnp.float32),
        grid_spec=pltpu.PrefetchScalarGridSpec(
            num_scalar_prefetch=0,
            grid=grid,
            in_specs=[
                pl.BlockSpec((1, tN, 1), lambda b, j: (b, j, 0)),  # inp column
                pl.BlockSpec((tN, D), lambda b, j: (j, 0)),        # base
                pl.BlockSpec((1, D), lambda b, j: (0, 0)),         # delta
            ],
            out_specs=pl.BlockSpec((1, tN, D), lambda b, j: (b, j, 0)),
        ),
        compiler_params=pltpu.CompilerParams(
            dimension_semantics=("parallel", "parallel")),
    )(inp_col, prep["base"], prep["delta"])


def vocab_emb_reference(inp, params, size):
    """Pure-JAX reference matching the PyTorch forward (standard, cat=True)."""
    H, W = size
    B = inp.shape[0]
    pix = params["map_w"][inp]                               # (B, N, D)
    xpos = jnp.tile(params["posencx_w"], (W, 1))             # (N, D)
    ypos = jnp.repeat(params["posency_w"], H, axis=0)        # (N, D)
    pos = jnp.concatenate([xpos, ypos], axis=-1)             # (N, 2D)
    pos = jnp.broadcast_to(pos[None], (B,) + pos.shape)      # (B, N, 2D)
    x = jnp.concatenate([pix, pos], axis=-1)                 # (B, N, 3D)
    return jnp.einsum('bnf,df->bnd', x, params["mapper_w"])  # (B, N, D)


if __name__ == "__main__":
    # small shapes: batch=2, image size (8, 8) -> seq N=64, d_model=32
    B = 2
    SIZE = (8, 8)
    D_MODEL = 32
    N = SIZE[0] * SIZE[1]

    key = jax.random.PRNGKey(0)
    key, kinp = jax.random.split(key)
    inp = jax.random.bernoulli(kinp, 0.5, (B, N)).astype(jnp.int32)  # {0,1}

    params = init_vocab_emb_params(key, D_MODEL, SIZE)
    prep = prepare_vocab_emb(params, SIZE)

    out = vocab_emb_forward(inp, prep)
    jax.block_until_ready(out)
    assert out.shape == (B, N, D_MODEL)

    ref = vocab_emb_reference(inp, params, SIZE)
    assert jnp.allclose(out, ref, atol=1e-3, rtol=1e-3), \
        float(jnp.max(jnp.abs(out - ref)))

    print("KERNEL_OK")
</pallas_src>

<mosaic_0001>
module attributes {stable_mosaic.version = 11 : i64} {
  func.func @_vocab_emb_kernel(%arg0: i32, %arg1: i32, %arg2: memref<1x64x1xi32, #tpu.memory_space<vmem>>, %arg3: memref<64x32xf32, #tpu.memory_space<vmem>>, %arg4: memref<1x32xf32, #tpu.memory_space<vmem>>, %arg5: memref<1x64x32xf32, #tpu.memory_space<vmem>>) attributes {dimension_semantics = [#tpu.dimension_semantics<parallel>, #tpu.dimension_semantics<parallel>], iteration_bounds = array<i64: 2, 1>, scalar_prefetch = 0 : i64, scratch_operands = 0 : i64, tpu.core_type = #tpu.core_type<tc>, window_params = [{transform_indices = @transform_0, window_bounds = array<i64: 1, 64, 1>}, {transform_indices = @transform_1, window_bounds = array<i64: 64, 32>}, {pipeline_mode = #tpu.pipeline_mode<synchronous>, transform_indices = @transform_2, window_bounds = array<i64: 1, 32>}, {transform_indices = @transform_3, window_bounds = array<i64: 1, 64, 32>}]} {
    %c0 = arith.constant 0 : index
    %c0_0 = arith.constant 0 : index
    %c0_1 = arith.constant 0 : index
    %0 = vector.load %arg2[%c0, %c0_0, %c0_1] : memref<1x64x1xi32, #tpu.memory_space<vmem>>, vector<1x64x1xi32>
    %1 = vector.shape_cast %0 : vector<1x64x1xi32> to vector<64x1xi32>
    %2 = arith.sitofp %1 : vector<64x1xi32> to vector<64x1xf32>
    %c0_2 = arith.constant 0 : index
    %c0_3 = arith.constant 0 : index
    %3 = vector.load %arg3[%c0_2, %c0_3] : memref<64x32xf32, #tpu.memory_space<vmem>>, vector<64x32xf32>
    %c0_4 = arith.constant 0 : index
    %c0_5 = arith.constant 0 : index
    %4 = vector.load %arg4[%c0_4, %c0_5] : memref<1x32xf32, #tpu.memory_space<vmem>>, vector<1x32xf32>
    %5 = vector.broadcast %2 : vector<64x1xf32> to vector<64x32xf32>
    %6 = vector.broadcast %4 : vector<1x32xf32> to vector<64x32xf32>
    %7 = arith.mulf %5, %6 : vector<64x32xf32>
    %8 = arith.addf %3, %7 : vector<64x32xf32>
    %c0_6 = arith.constant 0 : index
    %c0_7 = arith.constant 0 : index
    %c0_8 = arith.constant 0 : index
    %9 = vector.load %arg5[%c0_6, %c0_7, %c0_8] : memref<1x64x32xf32, #tpu.memory_space<vmem>>, vector<1x64x32xf32>
    %10 = vector.shape_cast %9 : vector<1x64x32xf32> to vector<64x32xf32>
    %11 = vector.shape_cast %8 : vector<64x32xf32> to vector<1x64x32xf32>
    tpu.vector_store %arg5[%c0_6, %c0_7, %c0_8], %11 {strides = array<i32>} : memref<1x64x32xf32, #tpu.memory_space<vmem>>, vector<1x64x32xf32>,
    return
  }
  func.func @transform_0(%arg0: i32, %arg1: i32) -> (i32, i32, i32) {
    %c0_i32 = arith.constant 0 : i32
    %c0_i32_0 = arith.constant 0 : i32
    return %arg0, %arg1, %c0_i32 : i32, i32, i32
  }
  func.func @transform_1(%arg0: i32, %arg1: i32) -> (i32, i32) {
    %c0_i32 = arith.constant 0 : i32
    %c0_i32_0 = arith.constant 0 : i32
    return %arg1, %c0_i32 : i32, i32
  }
  func.func @transform_2(%arg0: i32, %arg1: i32) -> (i32, i32) {
    %c0_i32 = arith.constant 0 : i32
    %c0_i32_0 = arith.constant 0 : i32
    %c0_i32_1 = arith.constant 0 : i32
    return %c0_i32, %c0_i32_0 : i32, i32
  }
  func.func @transform_3(%arg0: i32, %arg1: i32) -> (i32, i32, i32) {
    %c0_i32 = arith.constant 0 : i32
    %c0_i32_0 = arith.constant 0 : i32
    return %arg0, %arg1, %c0_i32 : i32, i32, i32
  }
}

</mosaic_0001>

<bundles_post_ra>
// kernel: tpu_custom_call.1
= control target key start
LH: loop header
LB: loop body
LE: loop exit
PB: predicated region body
PF: predicated region fallthrough
CT: control target
= control target key end

     0   :  { %s517_s12 = smov 0   ;;  %s519_s13 = smov 0   ;;  %s602_s0 = inlined_call_operand.vmem [shape: s32[2,64,1], index: 0, kind: input, shape index: {}]   ;;  %s603_s1 = inlined_call_operand.vmem [shape: f32[64,32], index: 1, kind: input, shape index: {}]   ;;  %s604_s2 = inlined_call_operand.vmem [shape: f32[1,32], index: 2, kind: input, shape index: {}]   ;;  %s605_s3 = inlined_call_operand.vmem [shape: f32[2,64,32], index: 3, kind: output, shape index: {}]  }
   0x1   :  { %s521_s14 = smov 0  }
   0x2 LB: > { %s25_s15 = sadd.s32 1, %s490_s13  ;;  %p435_p0 = scmp.ge.s32.totalorder %s494_s14, 1  ;;  %s494_s14 = sphi %s521_s14, %s13_s14   ;;  %s490_s13 = sphi %s519_s13, %s607_s13   ;;  %s486_s12 = sphi %s517_s12, %s606_s12  }
   0x3   : > { %p27_p1 = scmp.ge.s32.totalorder %s25_s15, 2  ;;  %p169_p2 = scmp.lt.s32.totalorder %s494_s14, 3 }
   0x5   : > { %s609_s15 = smov (%p27_p1, %s25_s15), 0  ;;  %p170_p3 = pnand %p435_p0, %p169_p2 }
   0x6   : > { %p207_p4 = scmp.lt.s32.totalorder (!%p170_p3), %s486_s12, 1  ;;  %v496_v0 = vmov (!%p170_p3), 0   ;;  %v440_v17 = vld [vmem:[%s604_s2] ss:$0 sm:$0xff] (!%p170_p3)  ;;  %v250_v18 = vld [vmem:[%s603_s1 + $0x10] sm:$0xff] (!%p170_p3)  ;;  %vm319_vm0 = vcmask (!%p170_p3), 261120  }
   0x7   : > { %173 = sbr.rel (%p170_p3) target bundleno = 165 (0xa5), region = 32  ;;  %471 = vset.pattern.permute.xlu1 (!%p170_p3), %v496_v0  ;;  %470 = vset.pattern.permute.xlu0 (!%p170_p3), %v496_v0  ;;  %v248_v20 = vld [vmem:[%s603_s1] sm:$0xff] (!%p170_p3)  ;;  %v251_v26 = vld [vmem:[%s603_s1 + $0x18] sm:$0xff] (!%p170_p3)  ;;  %v249_v28 = vld [vmem:[%s603_s1 + $0x8] sm:$0xff] (!%p170_p3) }
   0x8   : > { %v253_v34 = vld [vmem:[%s603_s1 + $0x28] sm:$0xff] (!%p170_p3)  ;;  %v252_v36 = vld [vmem:[%s603_s1 + $0x20] sm:$0xff] (!%p170_p3)  ;;  %v255_v42 = vld [vmem:[%s603_s1 + $0x38] sm:$0xff] (!%p170_p3) }
   0x9   : > { %v254_v44 = vld [vmem:[%s603_s1 + $0x30] sm:$0xff] (!%p170_p3) }
   0xe   : > { %s611_s12 = smov (!%p207_p4, %s486_s12), 1 }
   0xf   : > { %s443_s16 = sshll.u32 %s611_s12, 6 }
  0x10   : > { %s214_s19 = scalar_lea.vmem %s602_s0, %s443_s16  ;;  %s557_s28 = scalar_lea.vmem %s605_s3, %s443_s16 }
  0x11   : > { %v234_v1 = vld [vmem:[%s214_s19 + $0x10] sm:$0xff]  ;;  %v232_v2 = vld [vmem:[%s214_s19] sm:$0xff]  ;;  %v235_v3 = vld [vmem:[%s214_s19 + $0x18] sm:$0xff] }
  0x12   : > { %v242_v4 = vcvt.s32.f32 %v234_v1  ;;  %v240_v5 = vcvt.s32.f32 %v232_v2  ;;  %v233_v6 = vld [vmem:[%s214_s19 + $0x8] sm:$0xff]  ;;  %v243_v7 = vcvt.s32.f32 %v235_v3  ;;  %v236_v10 = vld [vmem:[%s214_s19 + $0x20] sm:$0xff]  ;;  %v239_v13 = vld [vmem:[%s214_s19 + $0x38] sm:$0xff] }
  0x13   : > { %v241_v8 = vcvt.s32.f32 %v233_v6  ;;  %v237_v9 = vld [vmem:[%s214_s19 + $0x28] sm:$0xff]  ;;  %v244_v12 = vcvt.s32.f32 %v236_v10  ;;  %v238_v14 = vld [vmem:[%s214_s19 + $0x30] sm:$0xff]  ;;  %v247_v15 = vcvt.s32.f32 %v239_v13 }
  0x14   : > { %269 = vperm.xlu1 %471, %v242_v4   ;;  %259 = vperm.xlu0 %470, %v240_v5   ;;  %v245_v11 = vcvt.s32.f32 %v237_v9  ;;  %v246_v16 = vcvt.s32.f32 %v238_v14 }
  0x18   : > { %274 = vperm.xlu1 %471, %v243_v7   ;;  %264 = vperm.xlu0 %470, %v241_v8  }
  0x1c   : > { %284 = vperm.xlu1 %471, %v245_v11   ;;  %279 = vperm.xlu0 %470, %v244_v12  }
  0x20   : > { %294 = vperm.xlu1 %471, %v247_v15   ;;  %289 = vperm.xlu0 %470, %v246_v16  }
  0x93   : > { %v270_v19 = vpop.permute.xlu1 %269  ;;  %v260_v21 = vpop.permute.xlu0 %259 }
  0x94   : > { %v305_v22 = vmul.f32 %v440_v17, %v270_v19  ;;  %v303_v23 = vmul.f32 %v440_v17, %v260_v21 }
  0x96   : > { %v313_v24 = vadd.f32 %v305_v22, %v250_v18  ;;  %v311_v25 = vadd.f32 %v303_v23, %v248_v20 }
  0x97   : > { %v275_v27 = vpop.permute.xlu1 %274  ;;  %v265_v29 = vpop.permute.xlu0 %264 }
  0x98   : > { %322 = vst.msk [vmem:[%s557_s28 + $0x10] sm:$0xff] %vm319_vm0, %v313_v24  ;;  %320 = vst.msk [vmem:[%s557_s28] sm:$0xff] %vm319_vm0, %v311_v25  ;;  %v306_v30 = vmul.f32 %v440_v17, %v275_v27  ;;  %v304_v31 = vmul.f32 %v440_v17, %v265_v29 }
  0x9a   : > { %v314_v32 = vadd.f32 %v306_v30, %v251_v26  ;;  %v312_v33 = vadd.f32 %v304_v31, %v249_v28 }
  0x9b   : > { %v285_v35 = vpop.permute.xlu1 %284  ;;  %v280_v37 = vpop.permute.xlu0 %279 }
  0x9c   : > { %323 = vst.msk [vmem:[%s557_s28 + $0x18] sm:$0xff] %vm319_vm0, %v314_v32  ;;  %321 = vst.msk [vmem:[%s557_s28 + $0x8] sm:$0xff] %vm319_vm0, %v312_v33  ;;  %v308_v38 = vmul.f32 %v440_v17, %v285_v35  ;;  %v307_v39 = vmul.f32 %v440_v17, %v280_v37 }
  0x9e   : > { %v316_v40 = vadd.f32 %v308_v38, %v253_v34  ;;  %v315_v41 = vadd.f32 %v307_v39, %v252_v36 }
  0x9f   : > { %v295_v43 = vpop.permute.xlu1 %294  ;;  %v290_v45 = vpop.permute.xlu0 %289 }
  0xa0   : > { %325 = vst.msk [vmem:[%s557_s28 + $0x28] sm:$0xff] %vm319_vm0, %v316_v40  ;;  %324 = vst.msk [vmem:[%s557_s28 + $0x20] sm:$0xff] %vm319_vm0, %v315_v41  ;;  %v310_v46 = vmul.f32 %v440_v17, %v295_v43  ;;  %v309_v47 = vmul.f32 %v440_v17, %v290_v45 }
  0xa2   : > { %v318_v48 = vadd.f32 %v310_v46, %v255_v42  ;;  %v317_v49 = vadd.f32 %v309_v47, %v254_v44 }
  0xa4   : > { %327 = vst.msk [vmem:[%s557_s28 + $0x38] sm:$0xff] %vm319_vm0, %v318_v48  ;;  %326 = vst.msk [vmem:[%s557_s28 + $0x30] sm:$0xff] %vm319_vm0, %v317_v49 }
  0xa5 PF: > { %s13_s14 = sadd.s32 1, %s494_s14   ;;  %s606_s12 = smov %s490_s13 }
  0xa6   : > { %p10_p5 = scmp.ge.s32.totalorder %s13_s14, 4   ;;  %s607_s13 = smov %s609_s15 }
  0xa8   :  { %12 = sbr.rel (!%p10_p5) target bundleno = 2 (0x2), region = 65 }

</bundles_post_ra>
